<compile_context>
chip_gen: v7x
topology: tpu7x:2x2x1
jax: 0.10.0
libtpu: 0.0.40
codegen_flags: <defaults>
</compile_context>

<pallas_src>
import math
from functools import partial

import jax
import jax.numpy as jnp
from jax.experimental import pallas as pl
from jax.experimental.pallas import tpu as pltpu

_LANE = 128
_SUBLANE = 8
_LANE_WIDTHS = (4096, 2048, 1024, 512, 256, 128)  # widest lane-dense slab first


def _pick_slab(n):
    """Lane-dense (rows, width, pad) factorization of n.

    pad == 0 whenever n is a multiple of 128 (the common case); only a ragged
    tail (< 128 elements) falls back to a padded (rows, 128) slab.
    """
    for w in _LANE_WIDTHS:
        if n % w == 0:
            return n // w, w, 0
    rows = -(-n // _LANE)
    return rows, _LANE, rows * _LANE - n


def _block_bytes_target():
    """~4 MiB f32 blocks on v6e/v7x (24 MiB pipeline footprint < 32 MiB scoped
    VMEM default), ~2 MiB on v5e (12 MiB < 16 MiB default)."""
    try:
        kind = jax.devices()[0].device_kind.lower()
    except Exception:
        kind = ""
    if "v5 lite" in kind or "v5e" in kind or "v5lite" in kind:
        return 2 * 1024 * 1024
    return 4 * 1024 * 1024


def _pick_block_rows(rows, width):
    """Block height: multiple of 8 sublanes targeting the per-chip block size,
    or the full row extent if the whole slab fits in one block."""
    br = _block_bytes_target() // (width * 4)      # f32 res_w stream sizing
    br = max((br // _SUBLANE) * _SUBLANE, _SUBLANE)
    if br >= rows:
        return rows                                # full-extent block (always legal)
    return br                                      # partial boundary block is masked by Pallas


@partial(
    jax.jit,
    static_argnames=("n", "rows", "width", "block_rows"),
    donate_argnums=(0,),
)
def _update_res_w(resw_slab, diff_slab, *, n, rows, width, block_rows):
    """res_w_new = res_w + 5e-6 * (diff**2 / n), in the (rows, width) slab layout.

    resw_slab : f32[rows, width]      -- donated; updated in place via aliasing.
    diff_slab : any-dtype[rows, width] (cast to f32 inside the kernel).
    """
    inv_n = float(1.0 / n)

    def kernel(resw_ref, diff_ref, out_ref):
        dv = diff_ref[...].astype(jnp.float32)           # in-kernel cast (free, VPU)
        grads_res = dv * dv * jnp.float32(inv_n)          # torch: grad of mean wrt res_w
        out_ref[...] = resw_ref[...] + jnp.float32(5e-6) * grads_res

    bytes_accessed = rows * width * (4 + diff_slab.dtype.itemsize + 4)
    return pl.pallas_call(
        kernel,
        out_shape=jax.ShapeDtypeStruct((rows, width), jnp.float32),
        grid=(pl.cdiv(rows, block_rows),),
        in_specs=[
            pl.BlockSpec((block_rows, width), lambda i: (i, 0)),  # res_w block
            pl.BlockSpec((block_rows, width), lambda i: (i, 0)),  # difference block
        ],
        out_specs=pl.BlockSpec((block_rows, width), lambda i: (i, 0)),
        input_output_aliases={0: 0},                       # res_w updated in place
        cost_estimate=pl.CostEstimate(
            flops=4 * rows * width, transcendentals=0, bytes_accessed=bytes_accessed
        ),
        compiler_params=pltpu.CompilerParams(
            dimension_semantics=("parallel",),
        ),
    )(resw_slab, diff_slab)


class LossAdaptive3:
    """Stateful wrapper mirroring the PyTorch Loss_Adaptive3 module.

    The adaptive weight `res_w` is carried between calls in a lane-dense
    (rows, width) slab chosen so that, for any numel that is a multiple of
    128, no padding/copy is ever needed on either the input or output path.
    `epoch` must be a Python int: the epoch < 2000 cold path is decided on the
    host and skips the kernel (and any read of `difference`) entirely.
    """

    def __init__(self, weight):
        self._shape = tuple(weight.shape)
        self._n = int(math.prod(self._shape))
        rows, width, pad = _pick_slab(self._n)
        self._rows, self._width, self._pad = rows, width, pad
        self._block_rows = _pick_block_rows(rows, width)
        # self.res_w = torch.ones_like(weight); padded tail (if any) is never read back.
        self._resw_slab = jnp.ones((rows, width), dtype=jnp.float32)

    @property
    def res_w(self):
        """res_w in the original layout — the `.detach().clone()` of the module."""
        if self._pad == 0:
            return self._resw_slab.reshape(self._shape)    # free metadata reshape
        # TODO(synk): ragged numel (% 128 != 0) pays one slice-copy here; could be
        # avoided by emitting a second, flat-layout kernel output.
        return self._resw_slab.reshape(-1)[: self._n].reshape(self._shape)

    def __call__(self, difference, epoch):
        assert tuple(difference.shape) == self._shape, "difference must match weight shape"
        if int(epoch) >= 2000:  # host-side branch: cold path is completely free
            if self._pad == 0:
                diff_slab = difference.reshape(self._rows, self._width)  # free reshape
            else:
                # TODO(synk): ragged numel — avoid this full-array pad by masking the
                # tail rows inside the kernel instead of materializing a padded copy.
                diff_slab = jnp.pad(difference.reshape(-1), (0, self._pad)).reshape(
                    self._rows, self._width
                )
            self._resw_slab = _update_res_w(
                self._resw_slab,
                diff_slab,
                n=self._n,
                rows=self._rows,
                width=self._width,
                block_rows=self._block_rows,
            )
        return self.res_w


if __name__ == "__main__":
    key = jax.random.PRNGKey(0)

    # Small NCHW residual field, consistent with a PDE residue tensor.
    B, C, H, W = 2, 4, 16, 16
    weight = jnp.zeros((B, C, H, W), dtype=jnp.float32)    # only the shape matters
    difference = jax.random.normal(key, (B, C, H, W), dtype=jnp.float32)

    n = difference.size
    inv_n = jnp.float32(1.0 / n)
    five_em6 = jnp.float32(5e-6)

    # --- Case 1: epoch < 2000 -> kernel skipped, res_w stays all ones. ---
    module = LossAdaptive3(weight)
    out_noupdate = jax.block_until_ready(module(difference, epoch=100))
    assert out_noupdate.shape == (B, C, H, W)
    assert jnp.array_equal(out_noupdate, jnp.ones_like(difference))

    # --- Case 2: epoch >= 2000 -> res_w += 5e-6 * diff^2 / N. ---
    out_update = jax.block_until_ready(module(difference, epoch=2500))
    ref_update = jnp.ones_like(difference) + five_em6 * (difference * difference * inv_n)
    assert out_update.shape == (B, C, H, W)
    assert jnp.allclose(out_update, ref_update, atol=1e-12, rtol=1e-6)

    # --- Case 3: larger residual magnitudes so the f32 increment is visible
    #     and the stateful accumulation across calls is exercised. ---
    diff_big = difference * 3.0e3
    module2 = LossAdaptive3(weight)
    out_big1 = jax.block_until_ready(module2(diff_big, epoch=3000))
    out_big2 = jax.block_until_ready(module2(diff_big, epoch=3001))
    ref_big1 = jnp.ones_like(diff_big) + five_em6 * (diff_big * diff_big * inv_n)
    ref_big2 = ref_big1 + five_em6 * (diff_big * diff_big * inv_n)
    assert jnp.allclose(out_big1, ref_big1, rtol=1e-6, atol=0.0)
    assert jnp.allclose(out_big2, ref_big2, rtol=1e-6, atol=0.0)
    assert float(jnp.max(out_big1)) > 1.0  # update actually moved res_w

    # --- Case 4: ragged numel (not a multiple of 128) -> padded fallback path. ---
    shape_r = (2, 3, 5, 5)                                  # N = 150
    diff_r = jax.random.normal(jax.random.PRNGKey(1), shape_r, dtype=jnp.float32) * 1.0e3
    module3 = LossAdaptive3(jnp.zeros(shape_r, dtype=jnp.float32))
    out_r = jax.block_until_ready(module3(diff_r, epoch=4000))
    ref_r = jnp.ones(shape_r, jnp.float32) + five_em6 * (
        diff_r * diff_r * jnp.float32(1.0 / diff_r.size)
    )
    assert out_r.shape == shape_r
    assert jnp.allclose(out_r, ref_r, rtol=1e-6, atol=0.0)

    # --- Case 5: multi-block grid with a masked partial boundary block
    #     (rows=20 not a multiple of block_rows=8) on the raw kernel. ---
    rows_t, width_t = 20, 128
    n_t = rows_t * width_t
    resw_t = jnp.ones((rows_t, width_t), jnp.float32)
    diff_t = jax.random.normal(jax.random.PRNGKey(2), (rows_t, width_t), jnp.float32) * 1.0e3
    out_t = jax.block_until_ready(
        _update_res_w(resw_t, diff_t, n=n_t, rows=rows_t, width=width_t, block_rows=8)
    )
    ref_t = 1.0 + five_em6 * (diff_t * diff_t * jnp.float32(1.0 / n_t))
    assert jnp.allclose(out_t, ref_t, rtol=1e-6, atol=0.0)

    print("KERNEL_OK")
</pallas_src>

<mosaic_0001>
module attributes {stable_mosaic.version = 11 : i64} {
  func.func @kernel(%arg0: i32, %arg1: memref<1x2048xf32, #tpu.memory_space<vmem>>, %arg2: memref<1x2048xf32, #tpu.memory_space<vmem>>, %arg3: memref<1x2048xf32, #tpu.memory_space<vmem>>) attributes {dimension_semantics = [#tpu.dimension_semantics<parallel>], iteration_bounds = array<i64: 1>, scalar_prefetch = 0 : i64, scratch_operands = 0 : i64, tpu.core_type = #tpu.core_type<tc>, window_params = [{transform_indices = @transform_0, window_bounds = array<i64: 1, 2048>}, {transform_indices = @transform_1, window_bounds = array<i64: 1, 2048>}, {transform_indices = @transform_2, window_bounds = array<i64: 1, 2048>}]} {
    %c0 = arith.constant 0 : index
    %c0_0 = arith.constant 0 : index
    %0 = vector.load %arg2[%c0, %c0_0] : memref<1x2048xf32, #tpu.memory_space<vmem>>, vector<1x2048xf32>
    %1 = arith.mulf %0, %0 : vector<1x2048xf32>
    %cst = arith.constant 4.8828125E-4 : f32
    %2 = vector.broadcast %cst : f32 to vector<1x2048xf32>
    %3 = arith.mulf %1, %2 : vector<1x2048xf32>
    %c0_1 = arith.constant 0 : index
    %c0_2 = arith.constant 0 : index
    %4 = vector.load %arg1[%c0_1, %c0_2] : memref<1x2048xf32, #tpu.memory_space<vmem>>, vector<1x2048xf32>
    %cst_3 = arith.constant 5.000000e-06 : f32
    %5 = vector.broadcast %cst_3 : f32 to vector<1x2048xf32>
    %6 = arith.mulf %5, %3 : vector<1x2048xf32>
    %7 = arith.addf %4, %6 : vector<1x2048xf32>
    %c0_4 = arith.constant 0 : index
    %c0_5 = arith.constant 0 : index
    %8 = vector.load %arg3[%c0_4, %c0_5] : memref<1x2048xf32, #tpu.memory_space<vmem>>, vector<1x2048xf32>
    tpu.vector_store %arg3[%c0_4, %c0_5], %7 {strides = array<i32>} : memref<1x2048xf32, #tpu.memory_space<vmem>>, vector<1x2048xf32>,
    return
  }
  func.func @transform_0(%arg0: i32) -> (i32, i32) {
    %c0_i32 = arith.constant 0 : i32
    %c0_i32_0 = arith.constant 0 : i32
    return %arg0, %c0_i32 : i32, i32
  }
  func.func @transform_1(%arg0: i32) -> (i32, i32) {
    %c0_i32 = arith.constant 0 : i32
    %c0_i32_0 = arith.constant 0 : i32
    return %arg0, %c0_i32 : i32, i32
  }
  func.func @transform_2(%arg0: i32) -> (i32, i32) {
    %c0_i32 = arith.constant 0 : i32
    %c0_i32_0 = arith.constant 0 : i32
    return %arg0, %c0_i32 : i32, i32
  }
}

</mosaic_0001>

<bundles_post_ra>
// kernel: _update_res_w.1
= control target key start
LH: loop header
LB: loop body
LE: loop exit
PB: predicated region body
PF: predicated region fallthrough
CT: control target
= control target key end

     0   :  { %7 = vsyncpa [#allocation3], 0  ;;  %s195_s0 = inlined_call_operand.hbm [shape: f32[1,2048], index: 0, kind: input, shape index: {}, may-alias: {0,2}]   ;;  %s196_s1 = inlined_call_operand.hbm [shape: f32[1,2048], index: 1, kind: input, shape index: {}]   ;;  %s197_s2 = inlined_call_operand.hbm [shape: f32[1,2048], index: 2, kind: output, shape index: {}, may-alias: {0,2}]  }
   0x1   :  { %8 = vsyncpa [#allocation6], 0 }
   0x2   :  { %9 = vsyncpa [#allocation4], 0  ;;  %s141_s9 = smov [#allocation2]   ;;  %s142_s11 = smov [#allocation5]  }
   0x3   :  { %s16_s10 = sshll.u32 %s141_s9, 4  ;;  %s26_s12 = sshll.u32 %s142_s11, 4  ;;  %s17_s10 = int_to_ptr.vmem [resolvable:$true] %s16_s10  ;;  %s27_s12 = int_to_ptr.vmem [resolvable:$true] %s26_s12 }
   0x4   :  { %s69_s15 = scalar_lea.hbm %s195_s0, 256 }
   0x5   :  { %p70_p0 = scmp.ne.s32.totalorder %s195_s0, %s69_s15  ;;  %p73_p1 = scmp.lt.u32.totalorder %s69_s15, %s195_s0 }
   0x7   :  { %p75_p2 = pnand %p73_p1, %p70_p0 }
   0x9   :  { %78 = shalt.err (!%p75_p2)
}
   0xa   :  { %s79_s20 = scalar_lea.vmem %s17_s10, 256  ;;  %p84_p4 = scmp.lt.s32.totalorder %s17_s10, %s17_s10 }
   0xb   :  { %p80_p3 = scmp.ne.s32.totalorder %s17_s10, %s79_s20  ;;  %p85_p5 = scmp.lt.s32.totalorder %s79_s20, %s79_s20 }
   0xd   :  { %p86_p6 = por %p85_p5, %p84_p4 }
   0xf   :  { %p87_p7 = pnand %p86_p6, %p80_p3 }
  0x11   :  { %90 = shalt.err (!%p87_p7)
}
  0x12   :  { %19 = dma.hbm_to_vmem [thread:$0]  %s195_s0, 256, %s17_s10, [#allocation3]  }
  0x13   :  { %s91_s25 = scalar_lea.hbm %s196_s1, 256 }
  0x14   :  { %p92_p8 = scmp.ne.s32.totalorder %s196_s1, %s91_s25  ;;  %p95_p9 = scmp.lt.u32.totalorder %s91_s25, %s196_s1 }
  0x16   :  { %p97_p10 = pnand %p95_p9, %p92_p8 }
  0x18   :  { %100 = shalt.err (!%p97_p10)
}
  0x19   :  { %s101_s30 = scalar_lea.vmem %s27_s12, 256  ;;  %p106_p12 = scmp.lt.s32.totalorder %s27_s12, %s27_s12 }
  0x1a   :  { %p102_p11 = scmp.ne.s32.totalorder %s27_s12, %s101_s30  ;;  %p107_p13 = scmp.lt.s32.totalorder %s101_s30, %s101_s30 }
  0x1c   :  { %p108_p0 = por %p107_p13, %p106_p12 }
  0x1e   :  { %p109_p1 = pnand %p108_p0, %p102_p11 }
  0x20   :  { %112 = shalt.err (!%p109_p1)
}
  0x21   :  { %29 = dma.hbm_to_vmem [thread:$0]  %s196_s1, 256, %s27_s12, [#allocation6]  }
  0x22   :  { %135 = dma.done.wait [#allocation3], 256  }
  0x23   :  { %136 = vsyncadd [#allocation3], 4294967040 }
  0x24   :  { %137 = dma.done.wait [#allocation6], 256  }
  0x25   :  { %138 = vsyncadd [#allocation6], 4294967040  ;;  %v36_v0 = vld [vmem:[#allocation5] sm:$0xff]  ;;  %v37_v1 = vld [vmem:[#allocation5 + $0x8] sm:$0xff]  ;;  %s143_s4 = smov [#allocation7]  }
  0x26   :  { %v38_v2 = vmul.f32 %v36_v0, %v36_v0  ;;  %v39_v3 = vmul.f32 %v37_v1, %v37_v1  ;;  %v42_v6 = vld [vmem:[#allocation2] sm:$0xff]  ;;  %v43_v7 = vld [vmem:[#allocation2 + $0x8] sm:$0xff]  ;;  %s56_s5 = sshll.u32 %s143_s4, 4  ;;  %s57_s5 = int_to_ptr.vmem [resolvable:$true] %s56_s5 }
  0x27   :  { %s113_s1 = scalar_lea.vmem %s57_s5, 256  ;;  %p118_p3 = scmp.lt.s32.totalorder %s57_s5, %s57_s5 }
  0x28   :  { %v40_v4 = vmul.f32 0.00048828125, %v38_v2  ;;  %v41_v5 = vmul.f32 0.00048828125, %v39_v3  ;;  %p114_p2 = scmp.ne.s32.totalorder %s57_s5, %s113_s1  ;;  %p119_p4 = scmp.lt.s32.totalorder %s113_s1, %s113_s1 }
  0x2a   :  { %v44_v8 = vmul.f32 5e-06, %v40_v4  ;;  %v45_v9 = vmul.f32 5e-06, %v41_v5  ;;  %p120_p5 = por %p119_p4, %p118_p3 }
  0x2c   :  { %v46_v10 = vadd.f32 %v44_v8, %v42_v6  ;;  %v47_v11 = vadd.f32 %v45_v9, %v43_v7  ;;  %p121_p6 = pnand %p120_p5, %p114_p2 }
  0x2e   :  { %48 = vst [vmem:[#allocation7] sm:$0xff] %v46_v10  ;;  %49 = vst [vmem:[#allocation7 + $0x8] sm:$0xff] %v47_v11 }
  0x2f   :  { %124 = shalt.err (!%p121_p6)
}
  0x30   :  { %s125_s8 = scalar_lea.hbm %s197_s2, 256 }
  0x31   :  { %p126_p7 = scmp.ne.s32.totalorder %s197_s2, %s125_s8  ;;  %p129_p8 = scmp.lt.u32.totalorder %s125_s8, %s197_s2 }
  0x33   :  { %p131_p9 = pnand %p129_p8, %p126_p7 }
  0x35   :  { %134 = shalt.err (!%p131_p9)
}
  0x36   :  { %59 = dma.vmem_to_hbm [thread:$0]  %s57_s5, 256, %s197_s2, [#allocation4]  }
  0x37   :  { %139 = dma.done.wait [#allocation4], 256  }
  0x38   :  { %140 = vsyncadd [#allocation4], 4294967040 }
  0x39   :  { %63 = vsyncpa [#allocation3], 1 }
  0x3a   :  { %64 = vsyncpa [#allocation6], 1 }
  0x3b   :  { %65 = vsyncpa [#allocation4], 1 }

</bundles_post_ra>
